<compile_context>
chip_gen: v7x
topology: tpu7x:2x2x1
jax: 0.10.0
libtpu: 0.0.40
codegen_flags: <defaults>
</compile_context>

<pallas_src>
import jax
import jax.numpy as jnp
import numpy as np
from jax import lax
from jax.experimental import pallas as pl
from jax.experimental.pallas import tpu as pltpu

EPS = 1e-5
# tap order must match the (ky, kx, c) flattening of the conv weights below
_TAPS = tuple((dy, dx) for dy in (-1, 0, 1) for dx in (-1, 0, 1))


def _round_up(x, m):
    return ((x + m - 1) // m) * m


def _make_kernel(W, R, Cout):
    inv_r = 1.0 / float(R)

    def lane_shift(a, d):
        # b[:, r] = a[:, (r + d) mod R]; wrap positions are masked by the caller.
        if d == 0:
            return a
        return pltpu.roll(a, shift=(-d) % R, axis=1)

    def im2col(a, mask_ref):
        # a: (C, R) -> (9*C, R); row k*C + c = channel c sampled at tap k = (dy, dx),
        # zeroed where the tap falls outside the HxW image (== the conv's zero padding).
        blocks = []
        for k, (dy, dx) in enumerate(_TAPS):
            shifted = lane_shift(a, dy * W + dx)
            if dy == 0 and dx == 0:
                blocks.append(shifted)
            else:
                blocks.append(shifted * mask_ref[k:k + 1, :])
        return jnp.concatenate(blocks, axis=0)

    def bn(y, g, b):
        # training-mode BN over the pixel axis; one pass, folded to a single scale/shift.
        s = jnp.sum(y, axis=1, keepdims=True)
        ss = jnp.sum(y * y, axis=1, keepdims=True)
        m = s * inv_r
        v = ss * inv_r - m * m
        scale = g * lax.rsqrt(v + EPS)
        shift = b - m * scale
        return y * scale + shift

    def kernel(x_ref, mask_ref, w1p_ref, g1p_ref, be1p_ref,
               w2_ref, g2_ref, be2_ref, out_ref):
        x = x_ref[...]                                               # (Cin_p, R)

        # ---- conv1 + projection conv fused into one K = 9*Cin_p MXU matmul ----
        p1 = im2col(x, mask_ref)                                     # (9*Cin_p, R)
        y1p = jnp.dot(w1p_ref[...], p1,
                      preferred_element_type=jnp.float32)            # (2*Cout, R)
        h1p = bn(y1p, g1p_ref[...], be1p_ref[...])

        # projection branch -> residual accumulator (out_ref), frees its live range
        out_ref[...] = h1p[Cout:, :]

        # ---- main branch: ReLU -> conv2 -> BN ----
        h1 = jnp.maximum(h1p[:Cout, :], 0.0)                         # (Cout, R)
        p2 = im2col(h1, mask_ref)                                    # (9*Cout, R)
        y2 = jnp.dot(w2_ref[...], p2,
                     preferred_element_type=jnp.float32)             # (Cout, R)
        h2 = bn(y2, g2_ref[...], be2_ref[...])

        # residual add + final ReLU
        out_ref[...] = jnp.maximum(out_ref[...] + h2, 0.0)

    return kernel


def _prep_conv_weight(w_hwio, ci_pad, co_pad):
    # (3,3,Ci,Co) -> (co_pad, 9*ci_pad); column (ky*3+kx)*ci_pad + c matches im2col rows.
    kh, kw, ci, co = w_hwio.shape
    w = jnp.pad(w_hwio, ((0, 0), (0, 0), (0, ci_pad - ci), (0, co_pad - co)))
    return jnp.transpose(w, (3, 0, 1, 2)).reshape(co_pad, kh * kw * ci_pad)


def _prep_bn_vec(v, c_pad):
    v = v.reshape(-1)
    return jnp.pad(v, (0, c_pad - v.shape[0])).reshape(c_pad, 1)


@jax.jit
def residual_block(x_nchw, params):
    """x_nchw: (N, Cin, H, W) float32. Returns (N, Cout, H, W) float32."""
    N, Cin, H, W = x_nchw.shape
    Cout = params["w1"].shape[-1]
    R = N * H * W
    Cip = _round_up(Cin, 8)     # sublane-aligned channel counts
    Cop = _round_up(Cout, 8)

    # NCHW -> (Cip, R): channels on sublanes, flattened pixels on the (lane) axis.
    x = jnp.pad(x_nchw.astype(jnp.float32), ((0, 0), (0, Cip - Cin), (0, 0), (0, 0)))
    x = jnp.transpose(x, (1, 0, 2, 3)).reshape(Cip, R)

    # conv1 & projection share their input -> fuse weights / BN affines along out-channels.
    w1p = jnp.concatenate([_prep_conv_weight(params["w1"], Cip, Cop),
                           _prep_conv_weight(params["wp"], Cip, Cop)], axis=0)
    g1p = jnp.concatenate([_prep_bn_vec(params["g1"], Cop),
                           _prep_bn_vec(params["gp"], Cop)], axis=0)
    be1p = jnp.concatenate([_prep_bn_vec(params["be1"], Cop),
                            _prep_bn_vec(params["bep"], Cop)], axis=0)
    w2 = _prep_conv_weight(params["w2"], Cop, Cop)
    g2 = _prep_bn_vec(params["g2"], Cop)
    be2 = _prep_bn_vec(params["be2"], Cop)
    # NOTE: conv biases b1/b2/bp are intentionally not passed: each conv is immediately
    # followed by training-mode BN, which subtracts the per-channel mean, so they cancel.

    # Static boundary masks for the 9 taps over the flattened (n, y, x) pixel axis.
    rr = np.arange(R)
    yy = (rr // W) % H
    xx = rr % W
    masks = np.stack(
        [((yy + dy >= 0) & (yy + dy < H) & (xx + dx >= 0) & (xx + dx < W))
         for (dy, dx) in _TAPS]).astype(np.float32)                  # (9, R)

    kernel = _make_kernel(W, R, Cop)
    out = pl.pallas_call(
        kernel,
        out_shape=jax.ShapeDtypeStruct((Cop, R), jnp.float32),
    )(x, jnp.asarray(masks), w1p, g1p, be1p, w2, g2, be2)

    out = out[:Cout].reshape(Cout, N, H, W)
    return jnp.transpose(out, (1, 0, 2, 3))                          # back to NCHW


def make_params(key, in_ch, out_ch):
    ks = jax.random.split(key, 9)
    scale1 = 1.0 / np.sqrt(in_ch * 9)
    scale2 = 1.0 / np.sqrt(out_ch * 9)

    def conv_w(k, ci, co, s):
        return jax.random.normal(k, (3, 3, ci, co), jnp.float32) * s

    return {
        # conv branch
        "w1": conv_w(ks[0], in_ch, out_ch, scale1),
        "b1": jax.random.normal(ks[1], (1, out_ch), jnp.float32) * 0.1,
        "g1": jnp.ones((1, out_ch), jnp.float32) + 0.1 * jax.random.normal(ks[2], (1, out_ch)),
        "be1": 0.1 * jax.random.normal(ks[3], (1, out_ch), jnp.float32),
        "w2": conv_w(ks[4], out_ch, out_ch, scale2),
        "b2": jax.random.normal(ks[5], (1, out_ch), jnp.float32) * 0.1,
        "g2": jnp.ones((1, out_ch), jnp.float32),
        "be2": jnp.zeros((1, out_ch), jnp.float32),
        # projection branch
        "wp": conv_w(ks[6], in_ch, out_ch, scale1),
        "bp": jax.random.normal(ks[7], (1, out_ch), jnp.float32) * 0.1,
        "gp": jnp.ones((1, out_ch), jnp.float32) + 0.1 * jax.random.normal(ks[8], (1, out_ch)),
        "bep": jnp.zeros((1, out_ch), jnp.float32),
    }


def reference_forward(x_nchw, params):
    """Pure-JAX (XLA conv) reference, including the conv biases."""
    x = jnp.transpose(x_nchw, (0, 2, 3, 1)).astype(jnp.float32)  # NHWC

    def conv(x, w, b):
        y = lax.conv_general_dilated(
            x, w, window_strides=(1, 1), padding="SAME",
            dimension_numbers=("NHWC", "HWIO", "NHWC"))
        return y + b.reshape(1, 1, 1, -1)

    def bn(y, g, be):
        m = jnp.mean(y, axis=(0, 1, 2), keepdims=True)
        v = jnp.mean((y - m) ** 2, axis=(0, 1, 2), keepdims=True)
        return (y - m) * lax.rsqrt(v + EPS) * g.reshape(1, 1, 1, -1) + be.reshape(1, 1, 1, -1)

    h1 = jnp.maximum(bn(conv(x, params["w1"], params["b1"]), params["g1"], params["be1"]), 0.0)
    h2 = bn(conv(h1, params["w2"], params["b2"]), params["g2"], params["be2"])
    hp = bn(conv(x, params["wp"], params["bp"]), params["gp"], params["bep"])
    out = jnp.maximum(h2 + hp, 0.0)
    return jnp.transpose(out, (0, 3, 1, 2))


if __name__ == "__main__":
    key = jax.random.PRNGKey(0)
    k_x, k_p = jax.random.split(key)

    N, Cin, Cout, H, W = 2, 4, 8, 16, 16
    x = jax.random.normal(k_x, (N, Cin, H, W), jnp.float32)
    params = make_params(k_p, Cin, Cout)

    out = jax.block_until_ready(residual_block(x, params))

    ref = jax.block_until_ready(reference_forward(x, params))
    err = float(jnp.max(jnp.abs(out - ref)))
    assert out.shape == (N, Cout, H, W), out.shape
    assert np.isfinite(err) and err < 1e-3, f"mismatch vs reference: {err}"

    print("KERNEL_OK")
</pallas_src>

<mosaic_0001>
module attributes {stable_mosaic.version = 11 : i64} {
  func.func @kernel(%arg0: memref<8x512xf32, #tpu.memory_space<vmem>>, %arg1: memref<9x512xf32, #tpu.memory_space<vmem>>, %arg2: memref<16x72xf32, #tpu.memory_space<vmem>>, %arg3: memref<16x1xf32, #tpu.memory_space<vmem>>, %arg4: memref<16x1xf32, #tpu.memory_space<vmem>>, %arg5: memref<8x72xf32, #tpu.memory_space<vmem>>, %arg6: memref<8x1xf32, #tpu.memory_space<vmem>>, %arg7: memref<8x1xf32, #tpu.memory_space<vmem>>, %arg8: memref<8x512xf32, #tpu.memory_space<vmem>>) attributes {dimension_semantics = [], scalar_prefetch = 0 : i64, scratch_operands = 0 : i64, tpu.core_type = #tpu.core_type<tc>} {
    %c0 = arith.constant 0 : index
    %c0_0 = arith.constant 0 : index
    %0 = vector.load %arg0[%c0, %c0_0] : memref<8x512xf32, #tpu.memory_space<vmem>>, vector<8x512xf32>
    %c17_i32 = arith.constant 17 : i32
    %1 = tpu.dynamic_rotate %0 by %c17_i32 dim 1 : vector<8x512xf32>, i32 -> vector<8x512xf32>
    %c0_1 = arith.constant 0 : index
    %c0_2 = arith.constant 0 : index
    %2 = vector.load %arg1[%c0_1, %c0_2] : memref<9x512xf32, #tpu.memory_space<vmem>>, vector<1x512xf32>
    %3 = vector.broadcast %2 : vector<1x512xf32> to vector<8x512xf32>
    %4 = arith.mulf %1, %3 : vector<8x512xf32>
    %c16_i32 = arith.constant 16 : i32
    %5 = tpu.dynamic_rotate %0 by %c16_i32 dim 1 : vector<8x512xf32>, i32 -> vector<8x512xf32>
    %c1 = arith.constant 1 : index
    %c0_3 = arith.constant 0 : index
    %6 = vector.load %arg1[%c1, %c0_3] : memref<9x512xf32, #tpu.memory_space<vmem>>, vector<1x512xf32>
    %7 = vector.broadcast %6 : vector<1x512xf32> to vector<8x512xf32>
    %8 = arith.mulf %5, %7 : vector<8x512xf32>
    %c15_i32 = arith.constant 15 : i32
    %9 = tpu.dynamic_rotate %0 by %c15_i32 dim 1 : vector<8x512xf32>, i32 -> vector<8x512xf32>
    %c2 = arith.constant 2 : index
    %c0_4 = arith.constant 0 : index
    %10 = vector.load %arg1[%c2, %c0_4] : memref<9x512xf32, #tpu.memory_space<vmem>>, vector<1x512xf32>
    %11 = vector.broadcast %10 : vector<1x512xf32> to vector<8x512xf32>
    %12 = arith.mulf %9, %11 : vector<8x512xf32>
    %c1_i32 = arith.constant 1 : i32
    %13 = tpu.dynamic_rotate %0 by %c1_i32 dim 1 : vector<8x512xf32>, i32 -> vector<8x512xf32>
    %c3 = arith.constant 3 : index
    %c0_5 = arith.constant 0 : index
    %14 = vector.load %arg1[%c3, %c0_5] : memref<9x512xf32, #tpu.memory_space<vmem>>, vector<1x512xf32>
    %15 = vector.broadcast %14 : vector<1x512xf32> to vector<8x512xf32>
    %16 = arith.mulf %13, %15 : vector<8x512xf32>
    %c511_i32 = arith.constant 511 : i32
    %17 = tpu.dynamic_rotate %0 by %c511_i32 dim 1 : vector<8x512xf32>, i32 -> vector<8x512xf32>
    %c5 = arith.constant 5 : index
    %c0_6 = arith.constant 0 : index
    %18 = vector.load %arg1[%c5, %c0_6] : memref<9x512xf32, #tpu.memory_space<vmem>>, vector<1x512xf32>
    %19 = vector.broadcast %18 : vector<1x512xf32> to vector<8x512xf32>
    %20 = arith.mulf %17, %19 : vector<8x512xf32>
    %c497_i32 = arith.constant 497 : i32
    %21 = tpu.dynamic_rotate %0 by %c497_i32 dim 1 : vector<8x512xf32>, i32 -> vector<8x512xf32>
    %c6 = arith.constant 6 : index
    %c0_7 = arith.constant 0 : index
    %22 = vector.load %arg1[%c6, %c0_7] : memref<9x512xf32, #tpu.memory_space<vmem>>, vector<1x512xf32>
    %23 = vector.broadcast %22 : vector<1x512xf32> to vector<8x512xf32>
    %24 = arith.mulf %21, %23 : vector<8x512xf32>
    %c496_i32 = arith.constant 496 : i32
    %25 = tpu.dynamic_rotate %0 by %c496_i32 dim 1 : vector<8x512xf32>, i32 -> vector<8x512xf32>
    %c7 = arith.constant 7 : index
    %c0_8 = arith.constant 0 : index
    %26 = vector.load %arg1[%c7, %c0_8] : memref<9x512xf32, #tpu.memory_space<vmem>>, vector<1x512xf32>
    %27 = vector.broadcast %26 : vector<1x512xf32> to vector<8x512xf32>
    %28 = arith.mulf %25, %27 : vector<8x512xf32>
    %c495_i32 = arith.constant 495 : i32
    %29 = tpu.dynamic_rotate %0 by %c495_i32 dim 1 : vector<8x512xf32>, i32 -> vector<8x512xf32>
    %c8 = arith.constant 8 : index
    %c0_9 = arith.constant 0 : index
    %30 = vector.load %arg1[%c8, %c0_9] : memref<9x512xf32, #tpu.memory_space<vmem>>, vector<1x512xf32>
    %31 = vector.broadcast %30 : vector<1x512xf32> to vector<8x512xf32>
    %32 = arith.mulf %29, %31 : vector<8x512xf32>
    %33 = tpu.concatenate %4, %8, %12, %16, %0, %20, %24, %28, %32 in 0 : vector<8x512xf32>, vector<8x512xf32>, vector<8x512xf32>, vector<8x512xf32>, vector<8x512xf32>, vector<8x512xf32>, vector<8x512xf32>, vector<8x512xf32>, vector<8x512xf32> -> vector<72x512xf32>
    %c0_10 = arith.constant 0 : index
    %c0_11 = arith.constant 0 : index
    %34 = vector.load %arg2[%c0_10, %c0_11] : memref<16x72xf32, #tpu.memory_space<vmem>>, vector<16x72xf32>
    %cst = arith.constant dense<0.000000e+00> : vector<16x512xf32>
    %35 = tpu.matmul %34, %33, %cst {dimension_numbers = #tpu.dot_dimension_numbers<[1], [0], [0], [1], [0, 0, 1, 1], [], []>} : vector<16x72xf32>, vector<72x512xf32>, vector<16x512xf32> -> vector<16x512xf32>
    %c0_12 = arith.constant 0 : index
    %c0_13 = arith.constant 0 : index
    %36 = vector.load %arg3[%c0_12, %c0_13] : memref<16x1xf32, #tpu.memory_space<vmem>>, vector<16x1xf32>
    %c0_14 = arith.constant 0 : index
    %c0_15 = arith.constant 0 : index
    %37 = vector.load %arg4[%c0_14, %c0_15] : memref<16x1xf32, #tpu.memory_space<vmem>>, vector<16x1xf32>
    %cst_16 = arith.constant dense<0.000000e+00> : vector<16xf32>
    %38 = vector.multi_reduction <add>, %35, %cst_16 [1] : vector<16x512xf32> to vector<16xf32>
    %39 = vector.shape_cast %38 : vector<16xf32> to vector<16x1xf32>
    %40 = arith.mulf %35, %35 : vector<16x512xf32>
    %cst_17 = arith.constant dense<0.000000e+00> : vector<16xf32>
    %41 = vector.multi_reduction <add>, %40, %cst_17 [1] : vector<16x512xf32> to vector<16xf32>
    %42 = vector.shape_cast %41 : vector<16xf32> to vector<16x1xf32>
    %cst_18 = arith.constant 0.001953125 : f32
    %43 = vector.broadcast %cst_18 : f32 to vector<16x1xf32>
    %44 = arith.mulf %39, %43 : vector<16x1xf32>
    %cst_19 = arith.constant 0.001953125 : f32
    %45 = vector.broadcast %cst_19 : f32 to vector<16x1xf32>
    %46 = arith.mulf %42, %45 : vector<16x1xf32>
    %47 = arith.mulf %44, %44 : vector<16x1xf32>
    %48 = arith.subf %46, %47 : vector<16x1xf32>
    %cst_20 = arith.constant 9.99999974E-6 : f32
    %49 = vector.broadcast %cst_20 : f32 to vector<16x1xf32>
    %50 = arith.addf %48, %49 : vector<16x1xf32>
    %51 = math.rsqrt %50 : vector<16x1xf32>
    %52 = arith.mulf %36, %51 : vector<16x1xf32>
    %53 = arith.mulf %44, %52 : vector<16x1xf32>
    %54 = arith.subf %37, %53 : vector<16x1xf32>
    %55 = vector.broadcast %52 : vector<16x1xf32> to vector<16x512xf32>
    %56 = arith.mulf %35, %55 : vector<16x512xf32>
    %57 = vector.broadcast %54 : vector<16x1xf32> to vector<16x512xf32>
    %58 = arith.addf %56, %57 : vector<16x512xf32>
    %59 = vector.extract_strided_slice %58 {offsets = [8, 0], sizes = [8, 512], strides = [1, 1]} : vector<16x512xf32> to vector<8x512xf32>
    %c0_21 = arith.constant 0 : index
    %c0_22 = arith.constant 0 : index
    %60 = vector.load %arg8[%c0_21, %c0_22] : memref<8x512xf32, #tpu.memory_space<vmem>>, vector<8x512xf32>
    tpu.vector_store %arg8[%c0_21, %c0_22], %59 {strides = array<i32>} : memref<8x512xf32, #tpu.memory_space<vmem>>, vector<8x512xf32>,
    %61 = vector.extract_strided_slice %58 {offsets = [0, 0], sizes = [8, 512], strides = [1, 1]} : vector<16x512xf32> to vector<8x512xf32>
    %cst_23 = arith.constant 0.000000e+00 : f32
    %62 = vector.broadcast %cst_23 : f32 to vector<8x512xf32>
    %63 = arith.maximumf %61, %62 : vector<8x512xf32>
    %c17_i32_24 = arith.constant 17 : i32
    %64 = tpu.dynamic_rotate %63 by %c17_i32_24 dim 1 : vector<8x512xf32>, i32 -> vector<8x512xf32>
    %c0_25 = arith.constant 0 : index
    %c0_26 = arith.constant 0 : index
    %65 = vector.load %arg1[%c0_25, %c0_26] : memref<9x512xf32, #tpu.memory_space<vmem>>, vector<1x512xf32>
    %66 = vector.broadcast %65 : vector<1x512xf32> to vector<8x512xf32>
    %67 = arith.mulf %64, %66 : vector<8x512xf32>
    %c16_i32_27 = arith.constant 16 : i32
    %68 = tpu.dynamic_rotate %63 by %c16_i32_27 dim 1 : vector<8x512xf32>, i32 -> vector<8x512xf32>
    %c1_28 = arith.constant 1 : index
    %c0_29 = arith.constant 0 : index
    %69 = vector.load %arg1[%c1_28, %c0_29] : memref<9x512xf32, #tpu.memory_space<vmem>>, vector<1x512xf32>
    %70 = vector.broadcast %69 : vector<1x512xf32> to vector<8x512xf32>
    %71 = arith.mulf %68, %70 : vector<8x512xf32>
    %c15_i32_30 = arith.constant 15 : i32
    %72 = tpu.dynamic_rotate %63 by %c15_i32_30 dim 1 : vector<8x512xf32>, i32 -> vector<8x512xf32>
    %c2_31 = arith.constant 2 : index
    %c0_32 = arith.constant 0 : index
    %73 = vector.load %arg1[%c2_31, %c0_32] : memref<9x512xf32, #tpu.memory_space<vmem>>, vector<1x512xf32>
    %74 = vector.broadcast %73 : vector<1x512xf32> to vector<8x512xf32>
    %75 = arith.mulf %72, %74 : vector<8x512xf32>
    %c1_i32_33 = arith.constant 1 : i32
    %76 = tpu.dynamic_rotate %63 by %c1_i32_33 dim 1 : vector<8x512xf32>, i32 -> vector<8x512xf32>
    %c3_34 = arith.constant 3 : index
    %c0_35 = arith.constant 0 : index
    %77 = vector.load %arg1[%c3_34, %c0_35] : memref<9x512xf32, #tpu.memory_space<vmem>>, vector<1x512xf32>
    %78 = vector.broadcast %77 : vector<1x512xf32> to vector<8x512xf32>
    %79 = arith.mulf %76, %78 : vector<8x512xf32>
    %c511_i32_36 = arith.constant 511 : i32
    %80 = tpu.dynamic_rotate %63 by %c511_i32_36 dim 1 : vector<8x512xf32>, i32 -> vector<8x512xf32>
    %c5_37 = arith.constant 5 : index
    %c0_38 = arith.constant 0 : index
    %81 = vector.load %arg1[%c5_37, %c0_38] : memref<9x512xf32, #tpu.memory_space<vmem>>, vector<1x512xf32>
    %82 = vector.broadcast %81 : vector<1x512xf32> to vector<8x512xf32>
    %83 = arith.mulf %80, %82 : vector<8x512xf32>
    %c497_i32_39 = arith.constant 497 : i32
    %84 = tpu.dynamic_rotate %63 by %c497_i32_39 dim 1 : vector<8x512xf32>, i32 -> vector<8x512xf32>
    %c6_40 = arith.constant 6 : index
    %c0_41 = arith.constant 0 : index
    %85 = vector.load %arg1[%c6_40, %c0_41] : memref<9x512xf32, #tpu.memory_space<vmem>>, vector<1x512xf32>
    %86 = vector.broadcast %85 : vector<1x512xf32> to vector<8x512xf32>
    %87 = arith.mulf %84, %86 : vector<8x512xf32>
    %c496_i32_42 = arith.constant 496 : i32
    %88 = tpu.dynamic_rotate %63 by %c496_i32_42 dim 1 : vector<8x512xf32>, i32 -> vector<8x512xf32>
    %c7_43 = arith.constant 7 : index
    %c0_44 = arith.constant 0 : index
    %89 = vector.load %arg1[%c7_43, %c0_44] : memref<9x512xf32, #tpu.memory_space<vmem>>, vector<1x512xf32>
    %90 = vector.broadcast %89 : vector<1x512xf32> to vector<8x512xf32>
    %91 = arith.mulf %88, %90 : vector<8x512xf32>
    %c495_i32_45 = arith.constant 495 : i32
    %92 = tpu.dynamic_rotate %63 by %c495_i32_45 dim 1 : vector<8x512xf32>, i32 -> vector<8x512xf32>
    %c8_46 = arith.constant 8 : index
    %c0_47 = arith.constant 0 : index
    %93 = vector.load %arg1[%c8_46, %c0_47] : memref<9x512xf32, #tpu.memory_space<vmem>>, vector<1x512xf32>
    %94 = vector.broadcast %93 : vector<1x512xf32> to vector<8x512xf32>
    %95 = arith.mulf %92, %94 : vector<8x512xf32>
    %96 = tpu.concatenate %67, %71, %75, %79, %63, %83, %87, %91, %95 in 0 : vector<8x512xf32>, vector<8x512xf32>, vector<8x512xf32>, vector<8x512xf32>, vector<8x512xf32>, vector<8x512xf32>, vector<8x512xf32>, vector<8x512xf32>, vector<8x512xf32> -> vector<72x512xf32>
    %c0_48 = arith.constant 0 : index
    %c0_49 = arith.constant 0 : index
    %97 = vector.load %arg5[%c0_48, %c0_49] : memref<8x72xf32, #tpu.memory_space<vmem>>, vector<8x72xf32>
    %cst_50 = arith.constant dense<0.000000e+00> : vector<8x512xf32>
    %98 = tpu.matmul %97, %96, %cst_50 {dimension_numbers = #tpu.dot_dimension_numbers<[1], [0], [0], [1], [0, 0, 1, 1], [], []>} : vector<8x72xf32>, vector<72x512xf32>, vector<8x512xf32> -> vector<8x512xf32>
    %c0_51 = arith.constant 0 : index
    %c0_52 = arith.constant 0 : index
    %99 = vector.load %arg6[%c0_51, %c0_52] : memref<8x1xf32, #tpu.memory_space<vmem>>, vector<8x1xf32>
    %c0_53 = arith.constant 0 : index
    %c0_54 = arith.constant 0 : index
    %100 = vector.load %arg7[%c0_53, %c0_54] : memref<8x1xf32, #tpu.memory_space<vmem>>, vector<8x1xf32>
    %cst_55 = arith.constant dense<0.000000e+00> : vector<8xf32>
    %101 = vector.multi_reduction <add>, %98, %cst_55 [1] : vector<8x512xf32> to vector<8xf32>
    %102 = vector.shape_cast %101 : vector<8xf32> to vector<8x1xf32>
    %103 = arith.mulf %98, %98 : vector<8x512xf32>
    %cst_56 = arith.constant dense<0.000000e+00> : vector<8xf32>
    %104 = vector.multi_reduction <add>, %103, %cst_56 [1] : vector<8x512xf32> to vector<8xf32>
    %105 = vector.shape_cast %104 : vector<8xf32> to vector<8x1xf32>
    %cst_57 = arith.constant 0.001953125 : f32
    %106 = vector.broadcast %cst_57 : f32 to vector<8x1xf32>
    %107 = arith.mulf %102, %106 : vector<8x1xf32>
    %cst_58 = arith.constant 0.001953125 : f32
    %108 = vector.broadcast %cst_58 : f32 to vector<8x1xf32>
    %109 = arith.mulf %105, %108 : vector<8x1xf32>
    %110 = arith.mulf %107, %107 : vector<8x1xf32>
    %111 = arith.subf %109, %110 : vector<8x1xf32>
    %cst_59 = arith.constant 9.99999974E-6 : f32
    %112 = vector.broadcast %cst_59 : f32 to vector<8x1xf32>
    %113 = arith.addf %111, %112 : vector<8x1xf32>
    %114 = math.rsqrt %113 : vector<8x1xf32>
    %115 = arith.mulf %99, %114 : vector<8x1xf32>
    %116 = arith.mulf %107, %115 : vector<8x1xf32>
    %117 = arith.subf %100, %116 : vector<8x1xf32>
    %118 = vector.broadcast %115 : vector<8x1xf32> to vector<8x512xf32>
    %119 = arith.mulf %98, %118 : vector<8x512xf32>
    %120 = vector.broadcast %117 : vector<8x1xf32> to vector<8x512xf32>
    %121 = arith.addf %119, %120 : vector<8x512xf32>
    %c0_60 = arith.constant 0 : index
    %c0_61 = arith.constant 0 : index
    %122 = vector.load %arg8[%c0_60, %c0_61] : memref<8x512xf32, #tpu.memory_space<vmem>>, vector<8x512xf32>
    %123 = arith.addf %122, %121 : vector<8x512xf32>
    %cst_62 = arith.constant 0.000000e+00 : f32
    %124 = vector.broadcast %cst_62 : f32 to vector<8x512xf32>
    %125 = arith.maximumf %123, %124 : vector<8x512xf32>
    %c0_63 = arith.constant 0 : index
    %c0_64 = arith.constant 0 : index
    %126 = vector.load %arg8[%c0_63, %c0_64] : memref<8x512xf32, #tpu.memory_space<vmem>>, vector<8x512xf32>
    tpu.vector_store %arg8[%c0_63, %c0_64], %125 {strides = array<i32>} : memref<8x512xf32, #tpu.memory_space<vmem>>, vector<8x512xf32>,
    return
  }
}

</mosaic_0001>

<bundles_post_ra>
// kernel: residual_block.1
= control target key start
LH: loop header
LB: loop body
LE: loop exit
PB: predicated region body
PF: predicated region fallthrough
CT: control target
= control target key end

     0   :  { %s1226_s29 = smov 16   ;;  %s1227_s30 = smov 17   ;;  %v1233_v4 = vmov 0.0   ;;  %v41_v5 = vlaneseq  ;;  %vm356_vm8 = vcmask 588800   ;;  %s1782_s0 = inlined_call_operand.vmem [shape: f32[8,512], index: 0, kind: input, shape index: {}]   ;;  %s1783_s1 = inlined_call_operand.vmem [shape: f32[9,512], index: 1, kind: input, shape index: {}]   ;;  %s1784_s2 = inlined_call_operand.vmem [shape: f32[16,72], index: 2, kind: input, shape index: {}]   ;;  %s1785_s3 = inlined_call_operand.vmem [shape: f32[16,1], index: 3, kind: input, shape index: {}]   ;;  %s1786_s4 = inlined_call_operand.vmem [shape: f32[16,1], index: 4, kind: input, shape index: {}]   ;;  %s1787_s5 = inlined_call_operand.vmem [shape: f32[8,72], index: 5, kind: input, shape index: {}]   ;;  %s1788_s6 = inlined_call_operand.vmem [shape: f32[8,1], index: 6, kind: input, shape index: {}]   ;;  %s1789_s7 = inlined_call_operand.vmem [shape: f32[8,1], index: 7, kind: input, shape index: {}]   ;;  %s1790_s8 = inlined_call_operand.vmem [shape: f32[8,512], index: 8, kind: output, shape index: {}]  }
   0x1   :  { %v1284_v0 = vld [vmem:[%s1782_s0] sm:$0xff]  ;;  %v1293_v1 = vld [vmem:[%s1782_s0 + $0x8] sm:$0xff]  ;;  %v1302_v2 = vld [vmem:[%s1782_s0 + $0x18] sm:$0xff]  ;;  %s1228_s15 = smov 15   ;;  %s1229_s16 = smov 1   ;;  %427 = vmatprep.mubr.f32.mxu0 %v1233_v4  ;;  %504 = vmatprep.mubr.f32.mxu1 %v1233_v4 }
   0x2   :  { %74 = vrot.lane.b32.xlu1 %v1284_v0, %s1226_s29  ;;  %33 = vrot.lane.b32.xlu0 %v1284_v0, %s1227_s30  ;;  %v1311_v3 = vld [vmem:[%s1782_s0 + $0x10] sm:$0xff]  ;;  %s1230_s0 = smov 127   ;;  %s1231_s17 = smov 113   ;;  %v51_v6 = vshrl.u32 %v41_v5, 7  ;;  %v1367_v7 = vand.u32 127, %v41_v5 }
   0x3   :  { %s1232_s18 = smov 112   ;;  %s1234_s19 = smov 111   ;;  %v1124_v9 = vld [vmem:[%s1783_s1 + $0x1] ss:$8 sm:$0xf] }
   0x4   :  { %v1369_v8 = vsub.s32 1, %v51_v6  ;;  %v48_v10 = vld [vmem:[%s1783_s1] ss:$8 sm:$0xf]  ;;  %v1377_v13 = vsub.s32 0, %v51_v6  ;;  %vm82_vm0 = vcmp.lt.s32.totalorder %v1367_v7, 16 }
   0x5   :  { %vm43_vm1 = vcmp.lt.s32.totalorder %v1367_v7, 17  ;;  %v1383_v18 = vsub.s32 2, %v51_v6  ;;  %v1385_v19 = vsub.s32 3, %v51_v6  ;;  %v1125_v48 = vld [vmem:[%s1783_s1 + $0x2] ss:$8 sm:$0xf] }
   0x6   :  { %76 = vrot.lane.b32.xlu1 %v1293_v1, %s1226_s29  ;;  %35 = vrot.lane.b32.xlu0 %v1293_v1, %s1227_s30  ;;  %v57_v14 = vrot.slane %v48_v10, %v1369_v8  ;;  %v97_v15 = vrot.slane %v1124_v9, %v1369_v8  ;;  %v93_v22 = vrot.slane %v1124_v9, %v1377_v13  ;;  %v1126_v49 = vld [vmem:[%s1783_s1 + $0x3] ss:$8 sm:$0xf]  ;;  %vm122_vm2 = vcmp.lt.s32.totalorder %v1367_v7, 15 }
   0x7   :  { %v53_v23 = vrot.slane %v48_v10, %v1377_v13  ;;  %v101_v31 = vrot.slane %v1124_v9, %v1383_v18  ;;  %v61_v32 = vrot.slane %v48_v10, %v1383_v18  ;;  %v65_v35 = vrot.slane %v48_v10, %v1385_v19 }
   0x8   :  { %v105_v36 = vrot.slane %v1124_v9, %v1385_v19  ;;  %v137_v54 = vrot.slane %v1125_v48, %v1369_v8  ;;  %vm162_vm3 = vcmp.lt.s32.totalorder %v1367_v7, 1  ;;  %v177_v55 = vrot.slane %v1126_v49, %v1369_v8 }
   0x9   :  { %v173_v62 = vrot.slane %v1126_v49, %v1377_v13  ;;  %v133_v63 = vrot.slane %v1125_v48, %v1377_v13  ;;  %vm202_vm4 = vcmp.lt.s32.totalorder %v1367_v7, 127  ;;  %vm242_vm5 = vcmp.lt.s32.totalorder %v1367_v7, 113 }
   0xa   :  { %80 = vrot.lane.b32.xlu1 %v1302_v2, %s1226_s29  ;;  %39 = vrot.lane.b32.xlu0 %v1302_v2, %s1227_s30  ;;  %vm282_vm6 = vcmp.lt.s32.totalorder %v1367_v7, 112  ;;  %vm322_vm7 = vcmp.lt.s32.totalorder %v1367_v7, 111  ;;  %v518_v7 = vld [vmem:[%s1785_s3 + $0x8] sm:$0xff] }
   0xe   :  { %78 = vrot.lane.b32.xlu1 %v1311_v3, %s1226_s29  ;;  %37 = vrot.lane.b32.xlu0 %v1311_v3, %s1227_s30 }
  0x12   :  { %116 = vrot.lane.b32.xlu1 %v1293_v1, %s1228_s15  ;;  %114 = vrot.lane.b32.xlu0 %v1284_v0, %s1228_s15 }
  0x16   :  { %156 = vrot.lane.b32.xlu1 %v1293_v1, %s1229_s16  ;;  %154 = vrot.lane.b32.xlu0 %v1284_v0, %s1229_s16 }
  0x1a   :  { %160 = vrot.lane.b32.xlu1 %v1302_v2, %s1229_s16  ;;  %120 = vrot.lane.b32.xlu0 %v1302_v2, %s1228_s15 }
  0x1e   :  { %158 = vrot.lane.b32.xlu1 %v1311_v3, %s1229_s16  ;;  %118 = vrot.lane.b32.xlu0 %v1311_v3, %s1228_s15 }
  0x22   :  { %198 = vrot.lane.b32.xlu1 %v1311_v3, %s1230_s0  ;;  %196 = vrot.lane.b32.xlu0 %v1293_v1, %s1230_s0 }
  0x26   :  { %200 = vrot.lane.b32.xlu1 %v1302_v2, %s1230_s0  ;;  %194 = vrot.lane.b32.xlu0 %v1284_v0, %s1230_s0 }
  0x2a   :  { %238 = vrot.lane.b32.xlu1 %v1311_v3, %s1231_s17  ;;  %236 = vrot.lane.b32.xlu0 %v1293_v1, %s1231_s17 }
  0x2e   :  { %278 = vrot.lane.b32.xlu1 %v1311_v3, %s1232_s18  ;;  %276 = vrot.lane.b32.xlu0 %v1293_v1, %s1232_s18 }
  0x32   :  { %274 = vrot.lane.b32.xlu1 %v1284_v0, %s1232_s18  ;;  %234 = vrot.lane.b32.xlu0 %v1284_v0, %s1231_s17 }
  0x36   :  { %280 = vrot.lane.b32.xlu1 %v1302_v2, %s1232_s18  ;;  %240 = vrot.lane.b32.xlu0 %v1302_v2, %s1231_s17 }
  0x3a   :  { %318 = vrot.lane.b32.xlu1 %v1311_v3, %s1234_s19  ;;  %316 = vrot.lane.b32.xlu0 %v1293_v1, %s1234_s19 }
  0x3e   :  { %320 = vrot.lane.b32.xlu1 %v1302_v2, %s1234_s19  ;;  %314 = vrot.lane.b32.xlu0 %v1284_v0, %s1234_s19 }
  0x74   :  { %v75_v11 = vpop.permute.xlu1 %74  ;;  %v34_v12 = vpop.permute.xlu0 %33 }
  0x78   :  { %v77_v16 = vpop.permute.xlu1 %76  ;;  %v36_v17 = vpop.permute.xlu0 %35 }
  0x79   :  { %v85_v20 = vsel %vm82_vm0, %v75_v11, %v77_v16  ;;  %v46_v21 = vsel %vm43_vm1, %v34_v12, %v36_v17 }
  0x7a   :  { %v71_v24 = vmul.f32 %v57_v14, %v46_v21  ;;  %v111_v25 = vmul.f32 %v97_v15, %v85_v20  ;;  %v185_v14 = vrot.slane %v1126_v49, %v1385_v19  ;;  %v1127_v15 = vld [vmem:[%s1783_s1 + $0x5] ss:$8 sm:$0xf]  ;;  %v141_v20 = vrot.slane %v1125_v48, %v1383_v18 }
  0x7b   :  { %v145_v21 = vrot.slane %v1125_v48, %v1385_v19 }
  0x7c   :  { %v81_v26 = vpop.permute.xlu1 %80  ;;  %v40_v27 = vpop.permute.xlu0 %39  ;;  %v1144_v28 = vpack.c.bf16 %v111_v25, %v71_v24  ;;  %v217_v25 = vrot.slane %v1127_v15, %v1369_v8 }
  0x7d   :  { %v86_v29 = vsel %vm82_vm0, %v81_v26, %v75_v11  ;;  %v47_v30 = vsel %vm43_vm1, %v40_v27, %v34_v12  ;;  %v181_v12 = vrot.slane %v1126_v49, %v1383_v18 }
  0x7e   :  { %v110_v33 = vmul.f32 %v93_v22, %v86_v29  ;;  %v70_v34 = vmul.f32 %v53_v23, %v47_v30  ;;  %1145 = vmatprep.subr.bf16.mxu0 %v1144_v28 }
  0x80   :  { %v79_v37 = vpop.permute.xlu1 %78  ;;  %v38_v38 = vpop.permute.xlu0 %37  ;;  %v1146_v39 = vpack.c.bf16 %v110_v33, %v70_v34 }
  0x81   :  { %v83_v40 = vsel %vm82_vm0, %v79_v37, %v81_v26  ;;  %v84_v41 = vsel %vm82_vm0, %v77_v16, %v79_v37  ;;  %v44_v42 = vsel %vm43_vm1, %v38_v38, %v40_v27  ;;  %v45_v43 = vsel %vm43_vm1, %v36_v17, %v38_v38 }
  0x82   :  { %v112_v44 = vmul.f32 %v101_v31, %v84_v41  ;;  %v72_v45 = vmul.f32 %v61_v32, %v45_v43  ;;  %1147 = vmatpush1.bf16.msra.mxu0 %v1146_v39  ;;  %v73_v46 = vmul.f32 %v65_v35, %v44_v42  ;;  %v113_v47 = vmul.f32 %v105_v36, %v83_v40 }
  0x83   :  { %v221_v40 = vrot.slane %v1127_v15, %v1383_v18  ;;  %v213_v41 = vrot.slane %v1127_v15, %v1377_v13  ;;  %v225_v42 = vrot.slane %v1127_v15, %v1385_v19 }
  0x84   :  { %v117_v50 = vpop.permute.xlu1 %116  ;;  %v115_v51 = vpop.permute.xlu0 %114  ;;  %v1160_v52 = vpack.c.bf16 %v113_v47, %v73_v46  ;;  %v1162_v53 = vpack.c.bf16 %v112_v44, %v72_v45 }
  0x85   :  { %v125_v56 = vsel %vm122_vm2, %v115_v51, %v117_v50 }
  0x86   :  { %1161 = vmatprep.subr.bf16.mxu1 %v1160_v52  ;;  %v151_v60 = vmul.f32 %v137_v54, %v125_v56  ;;  %v1128_v52 = vld [vmem:[%s1783_s1 + $0x6] ss:$8 sm:$0xf] }
  0x87   :  { %1163 = vmatpush1.bf16.msra.mxu1 %v1162_v53 }
  0x88   :  { %v157_v57 = vpop.permute.xlu1 %156  ;;  %v155_v58 = vpop.permute.xlu0 %154 }
  0x89   :  { %v165_v59 = vsel %vm162_vm3, %v155_v58, %v157_v57 }
  0x8a   :  { %v191_v61 = vmul.f32 %v177_v55, %v165_v59 }
  0x8c   :  { %v161_v5 = vpop.permute.xlu1 %160  ;;  %v121_v6 = vpop.permute.xlu0 %120  ;;  %v1148_v9 = vpack.c.bf16 %v191_v61, %v151_v60 }
  0x8d   :  { %v166_v10 = vsel %vm162_vm3, %v161_v5, %v155_v58  ;;  %v126_v11 = vsel %vm122_vm2, %v121_v6, %v115_v51  ;;  %v257_v58 = vrot.slane %v1128_v52, %v1369_v8 }
  0x8e   :  { %v190_v16 = vmul.f32 %v173_v62, %v166_v10  ;;  %v150_v17 = vmul.f32 %v133_v63, %v126_v11  ;;  %1149 = vmatprep.subr.bf16.mxu0 %v1148_v9 }
  0x90   :  { %v159_v22 = vpop.permute.xlu1 %158  ;;  %v119_v23 = vpop.permute.xlu0 %118  ;;  %v1150_v24 = vpack.c.bf16 %v190_v16, %v150_v17  ;;  %v1130_v16 = vld [vmem:[%s1783_s1 + $0x20] ss:$8 sm:$0xf] }
  0x91   :  { %v163_v26 = vsel %vm162_vm3, %v159_v22, %v161_v5  ;;  %v164_v27 = vsel %vm162_vm3, %v157_v57, %v159_v22  ;;  %v123_v28 = vsel %vm122_vm2, %v119_v23, %v121_v6  ;;  %v124_v29 = vsel %vm122_vm2, %v117_v50, %v119_v23 }
  0x92   :  { %v192_v30 = vmul.f32 %v181_v12, %v164_v27  ;;  %v193_v31 = vmul.f32 %v185_v14, %v163_v26  ;;  %v152_v32 = vmul.f32 %v141_v20, %v124_v29  ;;  %v153_v33 = vmul.f32 %v145_v21, %v123_v28  ;;  %1151 = vmatpush1.bf16.msra.mxu0 %v1150_v24 }
  0x93   :  { %v253_v5 = vrot.slane %v1128_v52, %v1377_v13  ;;  %v261_v21 = vrot.slane %v1128_v52, %v1383_v18  ;;  %v265_v22 = vrot.slane %v1128_v52, %v1385_v19  ;;  %v337_v26 = vrot.slane %v1130_v16, %v1369_v8  ;;  %v354_v52 = vld [vmem:[%s1784_s2] sm:$0xff] }
  0x94   :  { %v199_v34 = vpop.permute.xlu1 %198  ;;  %v197_v35 = vpop.permute.xlu0 %196  ;;  %v1164_v36 = vpack.c.bf16 %v193_v31, %v153_v33  ;;  %v1166_v37 = vpack.c.bf16 %v192_v30, %v152_v32 }
  0x95   :  { %v204_v38 = vsel %vm202_vm4, %v197_v35, %v199_v34 }
  0x96   :  { %v231_v39 = vmul.f32 %v217_v25, %v204_v38  ;;  %1165 = vmatprep.subr.bf16.mxu1 %v1164_v36 }
  0x97   :  { %1167 = vmatpush1.bf16.msra.mxu1 %v1166_v37 }
  0x98   :  { %v201_v43 = vpop.permute.xlu1 %200  ;;  %v195_v44 = vpop.permute.xlu0 %194  ;;  %v1152_v45 = vpack.c.bf16 %v231_v39, %v1293_v1  ;;  %v1129_v1 = vld [vmem:[%s1783_s1 + $0x7] ss:$8 sm:$0xf] }
  0x99   :  { %v203_v46 = vsel %vm202_vm4, %v199_v34, %v201_v43  ;;  %v205_v47 = vsel %vm202_vm4, %v195_v44, %v197_v35  ;;  %v206_v48 = vsel %vm202_vm4, %v201_v43, %v195_v44  ;;  %v297_v59 = vrot.slane %v1129_v1, %v1369_v8 }
  0x9a   :  { %v232_v49 = vmul.f32 %v221_v40, %v203_v46  ;;  %v230_v50 = vmul.f32 %v213_v41, %v205_v47  ;;  %v233_v51 = vmul.f32 %v225_v42, %v206_v48  ;;  %1153 = vmatprep.subr.bf16.mxu0 %v1152_v45  ;;  %v301_v14 = vrot.slane %v1129_v1, %v1383_v18 }
  0x9b   :  { %v305_v15 = vrot.slane %v1129_v1, %v1385_v19  ;;  %v341_v41 = vrot.slane %v1130_v16, %v1383_v18  ;;  %v333_v42 = vrot.slane %v1130_v16, %v1377_v13  ;;  %v345_v43 = vrot.slane %v1130_v16, %v1385_v19  ;;  %v517_v16 = vld [vmem:[%s1785_s3] sm:$0xff] }
  0x9c   :  { %v239_v53 = vpop.permute.xlu1 %238  ;;  %v237_v54 = vpop.permute.xlu0 %236  ;;  %v1154_v55 = vpack.c.bf16 %v230_v50, %v1284_v0  ;;  %v1168_v56 = vpack.c.bf16 %v233_v51, %v1302_v2  ;;  %v1170_v57 = vpack.c.bf16 %v232_v49, %v1311_v3  ;;  %v293_v3 = vrot.slane %v1129_v1, %v1377_v13 }
  0x9d   :  { %v244_v60 = vsel %vm242_vm5, %v237_v54, %v239_v53 }
  0x9e   :  { %1155 = vmatpush1.bf16.msra.mxu0 %v1154_v55  ;;  %1169 = vmatprep.subr.bf16.mxu1 %v1168_v56  ;;  %v271_v2 = vmul.f32 %v257_v58, %v244_v60 }
  0x9f   :  { %1171 = vmatpush1.bf16.msra.mxu1 %v1170_v57 }
  0xa0   :  { %v279_v61 = vpop.permute.xlu1 %278  ;;  %v277_v62 = vpop.permute.xlu0 %276 }
  0xa1   :  { %v284_v0 = vsel %vm282_vm6, %v277_v62, %v279_v61 }
  0xa2   :  { %v311_v63 = vmul.f32 %v297_v59, %v284_v0 }
  0xa4   :  { %v275_v6 = vpop.permute.xlu1 %274  ;;  %v235_v9 = vpop.permute.xlu0 %234  ;;  %v1156_v10 = vpack.c.bf16 %v311_v63, %v271_v2 }
  0xa5   :  { %v285_v11 = vsel %vm282_vm6, %v275_v6, %v277_v62  ;;  %v245_v12 = vsel %vm242_vm5, %v235_v9, %v237_v54 }
  0xa6   :  { %v310_v17 = vmul.f32 %v293_v3, %v285_v11  ;;  %v270_v20 = vmul.f32 %v253_v5, %v245_v12  ;;  %1157 = vmatprep.subr.bf16.mxu0 %v1156_v10  ;;  %v1235_v3 = vmov 0   ;;  %v355_v5 = vld [vmem:[%s1784_s2 + $0x8] sm:$0xff] }
  0xa7   :  { %1218 = vset.pattern.permute.xlu0 %v1235_v3  ;;  %1219 = vset.pattern.permute.xlu1 %v1235_v3 }
  0xa8   :  { %v281_v23 = vpop.permute.xlu1 %280  ;;  %v241_v24 = vpop.permute.xlu0 %240  ;;  %v1158_v25 = vpack.c.bf16 %v310_v17, %v270_v20 }
  0xa9   :  { %v283_v27 = vsel %vm282_vm6, %v279_v61, %v281_v23  ;;  %v286_v28 = vsel %vm282_vm6, %v281_v23, %v275_v6  ;;  %v243_v29 = vsel %vm242_vm5, %v239_v53, %v241_v24  ;;  %v246_v30 = vsel %vm242_vm5, %v241_v24, %v235_v9 }
  0xaa   :  { %v312_v31 = vmul.f32 %v301_v14, %v283_v27  ;;  %v313_v32 = vmul.f32 %v305_v15, %v286_v28  ;;  %v272_v33 = vmul.f32 %v261_v21, %v243_v29  ;;  %v273_v34 = vmul.f32 %v265_v22, %v246_v30  ;;  %1159 = vmatpush1.bf16.msra.mxu0 %v1158_v25  ;;  %v519_v21 = vld [vmem:[%s1786_s4] sm:$0xff] }
  0xac   :  { %v319_v35 = vpop.permute.xlu1 %318  ;;  %v317_v36 = vpop.permute.xlu0 %316  ;;  %v1172_v37 = vpack.c.bf16 %v313_v32, %v273_v34  ;;  %v1174_v38 = vpack.c.bf16 %v312_v31, %v272_v33 }
  0xad   :  { %v324_v39 = vsel %vm322_vm7, %v317_v36, %v319_v35 }
  0xae   :  { %v351_v40 = vmul.f32 %v337_v26, %v324_v39  ;;  %1173 = vmatprep.subr.bf16.mxu1 %v1172_v37 }
  0xaf   :  { %1175 = vmatpush1.bf16.msra.mxu1 %v1174_v38 }
  0xb0   :  { %v321_v44 = vpop.permute.xlu1 %320  ;;  %379 = vmatprep.subr.mxu0 %v351_v40  ;;  %v315_v45 = vpop.permute.xlu0 %314 }
  0xb1   :  { %v323_v46 = vsel %vm322_vm7, %v319_v35, %v321_v44  ;;  %v325_v47 = vsel %vm322_vm7, %v315_v45, %v317_v36  ;;  %v326_v48 = vsel %vm322_vm7, %v321_v44, %v315_v45 }
  0xb2   :  { %v352_v49 = vmul.f32 %v341_v41, %v323_v46  ;;  %v350_v50 = vmul.f32 %v333_v42, %v325_v47  ;;  %v353_v51 = vmul.f32 %v345_v43, %v326_v48 }
  0xb4   :  { %380 = vmatpush1.msra.mxu0 %v350_v50  ;;  %456 = vmatprep.subr.mxu1 %v353_v51 }
  0xb5   :  { %1131 = vmatmul.mubr.msk.f32.vlgmr.msra.gmra.mrb[0].mxu0 %vm356_vm8, %v354_v52  ;;  %457 = vmatpush1.msra.mxu1 %v352_v49 }
  0xb6   :  { %1133 = vmatmul.mubr.msk.f32.vlgmr.msra.gmra.mrb[0].mxu1 %vm356_vm8, %v354_v52  ;;  %433 = vmatprep.mubr.f32.mxu0 %v1233_v4 }
  0xb7   :  { %510 = vmatprep.mubr.f32.mxu1 %v1233_v4 }
  0xb9   :  { %1132 = vmatmul.mubr.msk.f32.gmra.mrb[2].mxu0 %vm356_vm8, %v355_v5 }
  0xba   :  { %1134 = vmatmul.mubr.msk.f32.gmra.mrb[2].mxu1 %vm356_vm8, %v355_v5  ;;  %983 = vmatprep.mubr.f32.mxu0 %v1233_v4 }
  0xbb   :  { %1054 = vmatprep.mubr.f32.mxu1 %v1233_v4 }
 0x188   :  { %v429_v1 = vpop.f32.mrb[0].mxu0 }
 0x189   :  { %v531_v53 = vmul.f32 %v429_v1, %v429_v1  ;;  %v431_v54 = vpop.f32.mrb[1].mxu0  ;;  %v506_v55 = vpop.f32.mrb[0].mxu1 }
 0x18a   :  { %v521_v56 = vadd.f32 %v431_v54, %v429_v1  ;;  %v532_v57 = vmul.f32 %v431_v54, %v431_v54  ;;  %v533_v58 = vmul.f32 %v506_v55, %v506_v55  ;;  %v508_v59 = vpop.f32.mrb[1].mxu1 }
 0x18b   :  { %v534_v0 = vmul.f32 %v508_v59, %v508_v59 }
 0x18c   :  { %v522_v60 = vadd.f32 %v521_v56, %v506_v55  ;;  %v539_v61 = vadd.f32 %v532_v57, %v531_v53  ;;  %v1529_v23 = vpop.f32.mrb[2].mxu0 }
 0x18d   :  { %v1531_v24 = vpop.f32.mrb[2].mxu1  ;;  %v535_v25 = vmul.f32 %v1529_v23, %v1529_v23  ;;  %v1535_v26 = vpop.f32.mrb[3].mxu0 }
 0x18e   :  { %v523_v62 = vadd.f32 %v522_v60, %v508_v59  ;;  %v540_v2 = vadd.f32 %v539_v61, %v533_v58  ;;  %v1537_v27 = vpop.f32.mrb[3].mxu1  ;;  %v526_v28 = vadd.f32 %v1535_v26, %v1529_v23  ;;  %v536_v29 = vmul.f32 %v1535_v26, %v1535_v26 }
 0x18f   :  { %v537_v30 = vmul.f32 %v1531_v24, %v1531_v24  ;;  %v538_v32 = vmul.f32 %v1537_v27, %v1537_v27 }
 0x190   :  { %524 = vadd.xlane.f32.xlu0 %v523_v62  ;;  %v541_v63 = vadd.f32 %v540_v2, %v534_v0  ;;  %v527_v31 = vadd.f32 %v526_v28, %v1531_v24  ;;  %v544_v33 = vadd.f32 %v536_v29, %v535_v25 }
 0x192   :  { %542 = vadd.xlane.f32.xlu1 %v541_v63  ;;  %v528_v34 = vadd.f32 %v527_v31, %v1537_v27  ;;  %v545_v35 = vadd.f32 %v544_v33, %v537_v30 }
 0x194   :  { %v546_v36 = vadd.f32 %v545_v35, %v538_v32 }
 0x21d   :  { %v525_v6 = vpop.xlane.xlu0 %524 }
 0x21e   :  { %v549_v9 = vmul.f32 0.001953125, %v525_v6 }
 0x21f   :  { %v543_v10 = vpop.xlane.xlu1 %542 }
 0x220   :  { %v553_v11 = vmul.f32 %v549_v9, %v549_v9  ;;  %v551_v12 = vmul.f32 0.001953125, %v543_v10 }
 0x222   :  { %v555_v14 = vsub.f32 %v551_v12, %v553_v11 }
 0x224   :  { %v557_v15 = vadd.f32 1e-05, %v555_v14 }
 0x226   :  { %1220 = vrsqrt.f32 %v557_v15 }
 0x230   :  { %v1221_v17 = vpop.eup %1220 }
 0x231   :  { %v561_v20 = vmul.f32 %v1221_v17, %v517_v16 }
 0x233   :  { %569 = vperm.xlu0 %1218, %v561_v20   ;;  %v563_v4 = vmul.f32 %v561_v20, %v549_v9 }
 0x235   :  { %v565_v22 = vsub.f32 %v519_v21, %v563_v4 }
 0x237   :  { %587 = vperm.xlu1 %1219, %v565_v22  }
 0x2b2   :  { %v570_v37 = vpop.permute.xlu0 %569 }
 0x2b3   :  { %v577_v38 = vmul.f32 %v570_v37, %v429_v1  ;;  %v579_v39 = vmul.f32 %v570_v37, %v506_v55  ;;  %v578_v41 = vmul.f32 %v570_v37, %v431_v54  ;;  %v580_v48 = vmul.f32 %v570_v37, %v508_v59  ;;  %v623_v54 = vld [vmem:[%s1783_s1] ss:$8 sm:$0xf]  ;;  %v1135_v55 = vld [vmem:[%s1783_s1 + $0x1] ss:$8 sm:$0xf] }
 0x2b4   :  { %v632_v58 = vrot.slane %v623_v54, %v1369_v8  ;;  %v670_v59 = vrot.slane %v1135_v55, %v1369_v8  ;;  %v628_v9 = vrot.slane %v623_v54, %v1377_v13  ;;  %v666_v10 = vrot.slane %v1135_v55, %v1377_v13  ;;  %v1137_v37 = vld [vmem:[%s1783_s1 + $0x3] ss:$8 sm:$0xf] }
 0x2b5   :  { %v636_v14 = vrot.slane %v623_v54, %v1383_v18  ;;  %v640_v15 = vrot.slane %v623_v54, %v1385_v19  ;;  %v674_v21 = vrot.slane %v1135_v55, %v1383_v18  ;;  %v678_v4 = vrot.slane %v1135_v55, %v1385_v19 }
 0x2b6   :  { %v588_v40 = vpop.permute.xlu1 %587  ;;  %v742_v55 = vrot.slane %v1137_v37, %v1377_v13 }
 0x2b7   :  { %v595_v42 = vadd.f32 %v588_v40, %v577_v38  ;;  %v597_v43 = vadd.f32 %v588_v40, %v579_v39  ;;  %v596_v44 = vadd.f32 %v588_v40, %v578_v41  ;;  %v598_v49 = vadd.f32 %v588_v40, %v580_v48  ;;  %v1136_v41 = vld [vmem:[%s1783_s1 + $0x2] ss:$8 sm:$0xf] }
 0x2b9   :  { %v1549_v45 = vmax.f32 %v595_v42, 0.0  ;;  %v1551_v46 = vmax.f32 %v597_v43, 0.0  ;;  %v1557_v47 = vmax.f32 %v596_v44, 0.0  ;;  %v1567_v50 = vmax.f32 %v598_v49, 0.0 }
 0x2ba   :  { %v708_v43 = vrot.slane %v1136_v41, %v1369_v8  ;;  %v746_v44 = vrot.slane %v1137_v37, %v1369_v8 }
 0x2bb   :  { %615 = vrot.lane.b32.xlu0 %v1551_v46, %s1227_s30  ;;  %611 = vrot.lane.b32.xlu1 %v1549_v45, %s1227_s30 }
 0x2bf   :  { %687 = vrot.lane.b32.xlu0 %v1549_v45, %s1228_s15  ;;  %613 = vrot.lane.b32.xlu1 %v1557_v47, %s1227_s30 }
 0x2c3   :  { %725 = vrot.lane.b32.xlu0 %v1549_v45, %s1229_s16  ;;  %649 = vrot.lane.b32.xlu1 %v1549_v45, %s1226_s29 }
 0x2c7   :  { %693 = vrot.lane.b32.xlu0 %v1567_v50, %s1228_s15  ;;  %651 = vrot.lane.b32.xlu1 %v1557_v47, %s1226_s29 }
 0x2cb   :  { %691 = vrot.lane.b32.xlu0 %v1551_v46, %s1228_s15  ;;  %617 = vrot.lane.b32.xlu1 %v1567_v50, %s1227_s30 }
 0x2cf   :  { %765 = vrot.lane.b32.xlu0 %v1557_v47, %s1230_s0  ;;  %655 = vrot.lane.b32.xlu1 %v1567_v50, %s1226_s29 }
 0x2d3   :  { %763 = vrot.lane.b32.xlu0 %v1549_v45, %s1230_s0  ;;  %653 = vrot.lane.b32.xlu1 %v1551_v46, %s1226_s29 }
 0x2d7   :  { %803 = vrot.lane.b32.xlu0 %v1557_v47, %s1231_s17  ;;  %689 = vrot.lane.b32.xlu1 %v1557_v47, %s1228_s15 }
 0x2db   :  { %841 = vrot.lane.b32.xlu0 %v1557_v47, %s1232_s18  ;;  %727 = vrot.lane.b32.xlu1 %v1557_v47, %s1229_s16 }
 0x2df   :  { %801 = vrot.lane.b32.xlu0 %v1549_v45, %s1231_s17  ;;  %731 = vrot.lane.b32.xlu1 %v1567_v50, %s1229_s16 }
 0x2e3   :  { %807 = vrot.lane.b32.xlu0 %v1567_v50, %s1231_s17  ;;  %729 = vrot.lane.b32.xlu1 %v1551_v46, %s1229_s16 }
 0x2e7   :  { %879 = vrot.lane.b32.xlu0 %v1557_v47, %s1234_s19  ;;  %767 = vrot.lane.b32.xlu1 %v1551_v46, %s1230_s0 }
 0x2eb   :  { %877 = vrot.lane.b32.xlu0 %v1549_v45, %s1234_s19  ;;  %769 = vrot.lane.b32.xlu1 %v1567_v50, %s1230_s0 }
 0x2ef   :  { %805 = vrot.lane.b32.xlu1 %v1551_v46, %s1231_s17 }
 0x2f3   :  { %843 = vrot.lane.b32.xlu1 %v1551_v46, %s1232_s18 }
 0x2f7   :  { %839 = vrot.lane.b32.xlu1 %v1549_v45, %s1232_s18 }
 0x2fb   :  { %845 = vrot.lane.b32.xlu1 %v1567_v50, %s1232_s18 }
 0x2ff   :  { %881 = vrot.lane.b32.xlu1 %v1551_v46, %s1234_s19 }
 0x303   :  { %883 = vrot.lane.b32.xlu1 %v1567_v50, %s1234_s19 }
 0x30a   :  { %529 = vadd.xlane.f32.xlu0 %v528_v34 }
 0x327   :  { %547 = vadd.xlane.f32.xlu1 %v546_v36 }
 0x32d   :  { %v616_v51 = vpop.permute.xlu0 %615  ;;  %v612_v52 = vpop.permute.xlu1 %611 }
 0x331   :  { %v688_v1 = vpop.permute.xlu0 %687  ;;  %v614_v53 = vpop.permute.xlu1 %613 }
 0x332   :  { %v621_v60 = vsel %vm43_vm1, %v612_v52, %v614_v53  ;;  %v620_v22 = vsel %vm43_vm1, %v614_v53, %v616_v51 }
 0x333   :  { %v646_v2 = vmul.f32 %v632_v58, %v621_v60  ;;  %v647_v33 = vmul.f32 %v636_v14, %v620_v22 }
 0x335   :  { %v726_v56 = vpop.permute.xlu0 %725  ;;  %v650_v57 = vpop.permute.xlu1 %649 }
 0x339   :  { %v694_v61 = vpop.permute.xlu0 %693  ;;  %v652_v62 = vpop.permute.xlu1 %651 }
 0x33a   :  { %v659_v0 = vsel %vm82_vm0, %v650_v57, %v652_v62 }
 0x33b   :  { %v684_v63 = vmul.f32 %v670_v59, %v659_v0  ;;  %v1138_v0 = vld [vmem:[%s1783_s1 + $0x5] ss:$8 sm:$0xf] }
 0x33d   :  { %v618_v3 = vpop.permute.xlu1 %617  ;;  %v1176_v5 = vpack.c.bf16 %v684_v63, %v646_v2  ;;  %v692_v6 = vpop.permute.xlu0 %691  ;;  %v712_v2 = vrot.slane %v1136_v41, %v1383_v18 }
 0x33e   :  { %v622_v11 = vsel %vm43_vm1, %v618_v3, %v612_v52  ;;  %v619_v25 = vsel %vm43_vm1, %v616_v51, %v618_v3  ;;  %v704_v52 = vrot.slane %v1136_v41, %v1377_v13  ;;  %v750_v3 = vrot.slane %v1137_v37, %v1383_v18 }
 0x33f   :  { %1177 = vmatprep.subr.bf16.mxu0 %v1176_v5  ;;  %v645_v17 = vmul.f32 %v628_v9, %v622_v11  ;;  %v648_v34 = vmul.f32 %v640_v15, %v619_v25 }
 0x341   :  { %v656_v12 = vpop.permute.xlu1 %655  ;;  %v766_v28 = vpop.permute.xlu0 %765 }
 0x342   :  { %v660_v16 = vsel %vm82_vm0, %v656_v12, %v650_v57  ;;  %v698_v57 = vsel %vm122_vm2, %v694_v61, %v688_v1 }
 0x343   :  { %v683_v20 = vmul.f32 %v666_v10, %v660_v16  ;;  %v721_v5 = vmul.f32 %v704_v52, %v698_v57  ;;  %v754_v10 = vrot.slane %v1137_v37, %v1385_v19 }
 0x345   :  { %v1178_v29 = vpack.c.bf16 %v683_v20, %v645_v17  ;;  %v654_v30 = vpop.permute.xlu1 %653  ;;  %v764_v42 = vpop.permute.xlu0 %763 }
 0x346   :  { %v657_v31 = vsel %vm82_vm0, %v654_v30, %v656_v12  ;;  %v658_v32 = vsel %vm82_vm0, %v652_v62, %v654_v30  ;;  %v716_v62 = vrot.slane %v1136_v41, %v1385_v19  ;;  %v780_v12 = vrot.slane %v1138_v0, %v1377_v13 }
 0x347   :  { %v685_v35 = vmul.f32 %v674_v21, %v658_v32  ;;  %v686_v36 = vmul.f32 %v678_v4, %v657_v31  ;;  %1179 = vmatpush1.bf16.msra.mxu0 %v1178_v29  ;;  %v773_v21 = vsel %vm202_vm4, %v764_v42, %v766_v28 }
 0x348   :  { %v797_v31 = vmul.f32 %v780_v12, %v773_v21 }
 0x349   :  { %v1194_v38 = vpack.c.bf16 %v685_v35, %v647_v33  ;;  %v690_v39 = vpop.permute.xlu1 %689  ;;  %v1192_v40 = vpack.c.bf16 %v686_v36, %v648_v34  ;;  %v1667_v58 = vpop.permute.xlu0 %803  ;;  %v788_v34 = vrot.slane %v1138_v0, %v1383_v18  ;;  %v792_v35 = vrot.slane %v1138_v0, %v1385_v19 }
 0x34a   :  { %v697_v48 = vsel %vm122_vm2, %v688_v1, %v690_v39  ;;  %v695_v1 = vsel %vm122_vm2, %v692_v6, %v694_v61  ;;  %v696_v11 = vsel %vm122_vm2, %v690_v39, %v692_v6  ;;  %v784_v61 = vrot.slane %v1138_v0, %v1369_v8 }
 0x34b   :  { %1193 = vmatprep.subr.bf16.mxu1 %v1192_v40  ;;  %v722_v53 = vmul.f32 %v708_v43, %v697_v48  ;;  %v724_v16 = vmul.f32 %v716_v62, %v695_v1  ;;  %v723_v4 = vmul.f32 %v712_v2, %v696_v11  ;;  %v1186_v39 = vpack.c.bf16 %v797_v31, %v1549_v45  ;;  %v1139_v45 = vld [vmem:[%s1783_s1 + $0x6] ss:$8 sm:$0xf] }
 0x34c   :  { %1195 = vmatpush1.bf16.msra.mxu1 %v1194_v38 }
 0x34d   :  { %v728_v49 = vpop.permute.xlu1 %727  ;;  %v842_v17 = vpop.permute.xlu0 %841 }
 0x34e   :  { %v735_v51 = vsel %vm162_vm3, %v726_v56, %v728_v49 }
 0x34f   :  { %v760_v54 = vmul.f32 %v746_v44, %v735_v51  ;;  %v1140_v44 = vld [vmem:[%s1783_s1 + $0x7] ss:$8 sm:$0xf] }
 0x350   :  { %v860_v52 = vrot.slane %v1140_v44, %v1369_v8  ;;  %v868_v11 = vrot.slane %v1140_v44, %v1385_v19 }
 0x351   :  { %v732_v59 = vpop.permute.xlu1 %731  ;;  %v1180_v60 = vpack.c.bf16 %v760_v54, %v722_v53  ;;  %v802_v36 = vpop.permute.xlu0 %801 }
 0x352   :  { %v736_v63 = vsel %vm162_vm3, %v732_v59, %v726_v56 }
 0x353   :  { %v759_v9 = vmul.f32 %v742_v55, %v736_v63  ;;  %1181 = vmatprep.subr.bf16.mxu0 %v1180_v60  ;;  %v811_v60 = vsel %vm242_vm5, %v802_v36, %v1667_v58  ;;  %v830_v63 = vrot.slane %v1139_v45, %v1385_v19 }
 0x355   :  { %v1182_v14 = vpack.c.bf16 %v759_v9, %v721_v5  ;;  %v730_v15 = vpop.permute.xlu1 %729  ;;  %v808_v51 = vpop.permute.xlu0 %807 }
 0x356   :  { %v733_v56 = vsel %vm162_vm3, %v730_v15, %v732_v59  ;;  %v734_v20 = vsel %vm162_vm3, %v728_v49, %v730_v15  ;;  %v856_v59 = vrot.slane %v1140_v44, %v1377_v13 }
 0x357   :  { %v761_v22 = vmul.f32 %v750_v3, %v734_v20  ;;  %v762_v6 = vmul.f32 %v754_v10, %v733_v56  ;;  %1183 = vmatpush1.bf16.msra.mxu0 %v1182_v14  ;;  %v826_v3 = vrot.slane %v1139_v45, %v1383_v18  ;;  %v864_v10 = vrot.slane %v1140_v44, %v1383_v18  ;;  %v1141_v14 = vld [vmem:[%s1783_s1 + $0x20] ss:$8 sm:$0xf] }
 0x359   :  { %v1198_v25 = vpack.c.bf16 %v761_v22, %v723_v4  ;;  %v768_v29 = vpop.permute.xlu1 %767  ;;  %v1196_v30 = vpack.c.bf16 %v762_v6, %v724_v16  ;;  %v880_v62 = vpop.permute.xlu0 %879 }
 0x35a   :  { %v772_v32 = vsel %vm202_vm4, %v766_v28, %v768_v29 }
 0x35b   :  { %v798_v33 = vmul.f32 %v784_v61, %v772_v32  ;;  %1197 = vmatprep.subr.bf16.mxu1 %v1196_v30  ;;  %v898_v61 = vrot.slane %v1141_v14, %v1369_v8 }
 0x35c   :  { %1199 = vmatpush1.bf16.msra.mxu1 %v1198_v25  ;;  %v894_v25 = vrot.slane %v1141_v14, %v1377_v13 }
 0x35d   :  { %v770_v37 = vpop.permute.xlu1 %769  ;;  %v1184_v38 = vpack.c.bf16 %v798_v33, %v1557_v47 }
 0x35e   :  { %v771_v40 = vsel %vm202_vm4, %v768_v29, %v770_v37  ;;  %v774_v41 = vsel %vm202_vm4, %v770_v37, %v764_v42  ;;  %v822_v42 = vrot.slane %v1139_v45, %v1369_v8  ;;  %v902_v8 = vrot.slane %v1141_v14, %v1383_v18 }
 0x35f   :  { %v799_v28 = vmul.f32 %v788_v34, %v771_v40  ;;  %v800_v43 = vmul.f32 %v792_v35, %v774_v41  ;;  %1185 = vmatprep.subr.bf16.mxu0 %v1184_v38  ;;  %v906_v35 = vrot.slane %v1141_v14, %v1385_v19 }
 0x360   :  { %1187 = vmatpush1.bf16.msra.mxu0 %v1186_v39 }
 0x361   :  { %v1202_v48 = vpack.c.bf16 %v799_v28, %v1551_v46  ;;  %v806_v49 = vpop.permute.xlu1 %805  ;;  %v1200_v47 = vpack.c.bf16 %v800_v43, %v1567_v50  ;;  %v818_v50 = vrot.slane %v1139_v45, %v1377_v13  ;;  %v915_v13 = vld [vmem:[%s1787_s5] sm:$0xff] }
 0x362   :  { %v810_v53 = vsel %vm242_vm5, %v1667_v58, %v806_v49  ;;  %v812_v58 = vsel %vm242_vm5, %v808_v51, %v802_v36  ;;  %v809_v12 = vsel %vm242_vm5, %v806_v49, %v808_v51 }
 0x363   :  { %1201 = vmatprep.subr.bf16.mxu1 %v1200_v47  ;;  %v836_v55 = vmul.f32 %v822_v42, %v810_v53  ;;  %v835_v1 = vmul.f32 %v818_v50, %v811_v60  ;;  %v838_v21 = vmul.f32 %v830_v63, %v812_v58  ;;  %v837_v4 = vmul.f32 %v826_v3, %v809_v12  ;;  %v520_v3 = vld [vmem:[%s1786_s4 + $0x8] sm:$0xff] }
 0x364   :  { %1203 = vmatpush1.bf16.msra.mxu1 %v1202_v48 }
 0x365   :  { %v844_v54 = vpop.permute.xlu1 %843 }
 0x366   :  { %v848_v46 = vsel %vm282_vm6, %v842_v17, %v844_v54 }
 0x367   :  { %v874_v57 = vmul.f32 %v860_v52, %v848_v46 }
 0x369   :  { %v840_v0 = vpop.permute.xlu1 %839  ;;  %v1188_v2 = vpack.c.bf16 %v874_v57, %v836_v55 }
 0x36a   :  { %v849_v5 = vsel %vm282_vm6, %v840_v0, %v842_v17  ;;  %v878_v17 = vpop.permute.xlu0 %877 }
 0x36b   :  { %v873_v9 = vmul.f32 %v856_v59, %v849_v5  ;;  %1189 = vmatprep.subr.bf16.mxu0 %v1188_v2  ;;  %v887_v29 = vsel %vm322_vm7, %v878_v17, %v880_v62 }
 0x36c   :  { %v911_v36 = vmul.f32 %v894_v25, %v887_v29 }
 0x36d   :  { %v1190_v15 = vpack.c.bf16 %v873_v9, %v835_v1  ;;  %v846_v16 = vpop.permute.xlu1 %845 }
 0x36e   :  { %v847_v56 = vsel %vm282_vm6, %v844_v54, %v846_v16  ;;  %v850_v20 = vsel %vm282_vm6, %v846_v16, %v840_v0 }
 0x36f   :  { %v875_v22 = vmul.f32 %v864_v10, %v847_v56  ;;  %v876_v6 = vmul.f32 %v868_v11, %v850_v20  ;;  %1191 = vmatpush1.bf16.msra.mxu0 %v1190_v15  ;;  %v1061_v15 = vld [vmem:[%s1788_s6] sm:$0xff] }
 0x370   :  { %v1062_v56 = vld [vmem:[%s1789_s7] sm:$0xff] }
 0x371   :  { %v1206_v30 = vpack.c.bf16 %v875_v22, %v837_v4  ;;  %v882_v31 = vpop.permute.xlu1 %881  ;;  %v1204_v32 = vpack.c.bf16 %v876_v6, %v838_v21 }
 0x372   :  { %v886_v33 = vsel %vm322_vm7, %v880_v62, %v882_v31 }
 0x373   :  { %v912_v34 = vmul.f32 %v898_v61, %v886_v33  ;;  %1205 = vmatprep.subr.bf16.mxu1 %v1204_v32 }
 0x374   :  { %1207 = vmatpush1.bf16.msra.mxu1 %v1206_v30 }
 0x375   :  { %935 = vmatprep.subr.mxu0 %v912_v34  ;;  %v884_v37 = vpop.permute.xlu1 %883 }
 0x376   :  { %v885_v38 = vsel %vm322_vm7, %v882_v31, %v884_v37  ;;  %v888_v39 = vsel %vm322_vm7, %v884_v37, %v878_v17  ;;  %936 = vmatpush1.msra.mxu0 %v911_v36 }
 0x377   :  { %v913_v40 = vmul.f32 %v902_v8, %v885_v38  ;;  %v914_v41 = vmul.f32 %v906_v35, %v888_v39  ;;  %1142 = vmatmul.mubr.msk.f32.vlgmr.msra.gmra.mrb[4].mxu0 %vm356_vm8, %v915_v13 }
 0x379   :  { %1006 = vmatprep.subr.mxu1 %v914_v41 }
 0x37a   :  { %1007 = vmatpush1.msra.mxu1 %v913_v40 }
 0x37b   :  { %1143 = vmatmul.mubr.msk.f32.vlgmr.msra.gmra.mrb[4].mxu1 %vm356_vm8, %v915_v13 }
 0x397   :  { %v530_v18 = vpop.xlane.xlu0 %529 }
 0x398   :  { %v550_v19 = vmul.f32 0.001953125, %v530_v18 }
 0x39a   :  { %v554_v28 = vmul.f32 %v550_v19, %v550_v19 }
 0x3b4   :  { %v548_v43 = vpop.xlane.xlu1 %547 }
 0x3b5   :  { %v552_v44 = vmul.f32 0.001953125, %v548_v43 }
 0x3b7   :  { %v556_v48 = vsub.f32 %v552_v44, %v554_v28 }
 0x3b9   :  { %v558_v49 = vadd.f32 1e-05, %v556_v48 }
 0x3bb   :  { %1222 = vrsqrt.f32 %v558_v49 }
 0x3c5   :  { %v1223_v47 = vpop.eup %1222 }
 0x3c6   :  { %v562_v45 = vmul.f32 %v1223_v47, %v518_v7 }
 0x3c8   :  { %574 = vperm.xlu1 %1219, %v562_v45   ;;  %v564_v51 = vmul.f32 %v562_v45, %v550_v19 }
 0x3ca   :  { %v566_v5 = vsub.f32 %v520_v3, %v564_v51 }
 0x447   :  { %v575_v21 = vpop.permute.xlu1 %574 }
 0x448   :  { %v581_v6 = vmul.f32 %v575_v21, %v1529_v23  ;;  %v582_v25 = vmul.f32 %v575_v21, %v1535_v26  ;;  %v583_v29 = vmul.f32 %v575_v21, %v1531_v24  ;;  %v584_v30 = vmul.f32 %v575_v21, %v1537_v27 }
 0x44a   :  { %v985_v42 = vpop.f32.mrb[4].mxu0 }
 0x44b   :  { %v1068_v52 = vmul.f32 %v985_v42, %v985_v42  ;;  %v987_v53 = vpop.f32.mrb[5].mxu0 }
 0x44c   :  { %v1063_v54 = vadd.f32 %v987_v53, %v985_v42  ;;  %v1069_v46 = vmul.f32 %v987_v53, %v987_v53 }
 0x44e   :  { %v1072_v50 = vadd.f32 %v1069_v46, %v1068_v52  ;;  %v1056_v55 = vpop.f32.mrb[4].mxu1 }
 0x44f   :  { %v1070_v57 = vmul.f32 %v1056_v55, %v1056_v55  ;;  %v1058_v59 = vpop.f32.mrb[5].mxu1  ;;  %v1064_v60 = vadd.f32 %v1063_v54, %v1056_v55 }
 0x450   :  { %v1071_v62 = vmul.f32 %v1058_v59, %v1058_v59 }
 0x451   :  { %v1065_v0 = vadd.f32 %v1064_v60, %v1058_v59  ;;  %v1073_v2 = vadd.f32 %v1072_v50, %v1070_v57 }
 0x453   :  { %1066 = vadd.xlane.f32.xlu0 %v1065_v0  ;;  %v1074_v63 = vadd.f32 %v1073_v2, %v1071_v62 }
 0x457   :  { %1075 = vadd.xlane.f32.xlu0 %v1074_v63 }
 0x46d   :  { %592 = vperm.xlu0 %1218, %v566_v5  }
 0x4e0   :  { %v1067_v1 = vpop.xlane.xlu0 %1066 }
 0x4e1   :  { %v1077_v9 = vmul.f32 0.001953125, %v1067_v1 }
 0x4e3   :  { %v1079_v11 = vmul.f32 %v1077_v9, %v1077_v9 }
 0x4e4   :  { %v1076_v10 = vpop.xlane.xlu0 %1075 }
 0x4e5   :  { %v1078_v58 = vmul.f32 0.001953125, %v1076_v10 }
 0x4e7   :  { %v1080_v12 = vsub.f32 %v1078_v58, %v1079_v11 }
 0x4e9   :  { %v1081_v14 = vadd.f32 1e-05, %v1080_v12 }
 0x4eb   :  { %1224 = vrsqrt.f32 %v1081_v14 }
 0x4ec   :  { %v593_v22 = vpop.permute.xlu0 %592 }
 0x4ed   :  { %v599_v8 = vadd.f32 %v593_v22, %v581_v6  ;;  %v600_v35 = vadd.f32 %v593_v22, %v582_v25  ;;  %v601_v36 = vadd.f32 %v593_v22, %v583_v29  ;;  %v602_v13 = vadd.f32 %v593_v22, %v584_v30 }
 0x4f5   :  { %v1225_v16 = vpop.eup %1224 }
 0x4f6   :  { %v1083_v17 = vmul.f32 %v1225_v16, %v1061_v15 }
 0x4f8   :  { %1088 = vperm.xlu1 %1219, %v1083_v17   ;;  %v1084_v20 = vmul.f32 %v1083_v17, %v1077_v9 }
 0x4fa   :  { %v1085_v61 = vsub.f32 %v1062_v56, %v1084_v20 }
 0x4fc   :  { %1097 = vperm.xlu1 %1219, %v1085_v61  }
 0x577   :  { %v1089_v4 = vpop.permute.xlu1 %1088 }
 0x578   :  { %v1091_v31 = vmul.f32 %v1089_v4, %v985_v42  ;;  %v1092_v32 = vmul.f32 %v1089_v4, %v987_v53  ;;  %v1093_v33 = vmul.f32 %v1089_v4, %v1056_v55  ;;  %v1094_v34 = vmul.f32 %v1089_v4, %v1058_v59 }
 0x57b   :  { %v1098_v37 = vpop.permute.xlu1 %1097 }
 0x57c   :  { %v1100_v38 = vadd.f32 %v1098_v37, %v1091_v31  ;;  %v1101_v39 = vadd.f32 %v1098_v37, %v1092_v32  ;;  %v1102_v40 = vadd.f32 %v1098_v37, %v1093_v33  ;;  %v1103_v41 = vadd.f32 %v1098_v37, %v1094_v34 }
 0x57e   :  { %v1108_v23 = vadd.f32 %v1100_v38, %v599_v8  ;;  %v1109_v18 = vadd.f32 %v1101_v39, %v600_v35  ;;  %v1110_v26 = vadd.f32 %v1102_v40, %v601_v36  ;;  %v1111_v19 = vadd.f32 %v1103_v41, %v602_v13 }
 0x580   :  { %v1112_v24 = vmax.f32 %v1108_v23, 0.0  ;;  %v1113_v28 = vmax.f32 %v1109_v18, 0.0  ;;  %v1114_v27 = vmax.f32 %v1110_v26, 0.0  ;;  %v1115_v43 = vmax.f32 %v1111_v19, 0.0 }
 0x582   :  { %1116 = vst [vmem:[%s1790_s8] sm:$0xff] %v1112_v24  ;;  %1117 = vst [vmem:[%s1790_s8 + $0x8] sm:$0xff] %v1113_v28 }
 0x583   :  { %1118 = vst [vmem:[%s1790_s8 + $0x10] sm:$0xff] %v1114_v27  ;;  %1119 = vst [vmem:[%s1790_s8 + $0x18] sm:$0xff] %v1115_v43 }

</bundles_post_ra>
